<compile_context>
chip_gen: v7x
topology: tpu7x:2x2x1
jax: 0.10.0
libtpu: 0.0.40
codegen_flags: <defaults>
</compile_context>

<pallas_src>
from functools import lru_cache, partial

import numpy as np
import jax
import jax.numpy as jnp
from jax.experimental import pallas as pl
from jax.experimental.pallas import tpu as pltpu


# --------------------------------------------------------------------------- #
# Kernel                                                                      #
# --------------------------------------------------------------------------- #
def _span_mask_kernel(mask_ref, x_ref, o_ref):
    """mask_ref: (1, tl) f32 mask, already clamped to [0, 1]; resident across
    the BH grid axis (its block index ignores the innermost grid dimension).
    x_ref / o_ref: (TB, tl) block of the flattened (B*H, T*T) score tensor."""
    m = mask_ref[...]                                   # (1, tl) float32
    out = jnp.where(m == 0.0, 0.0, x_ref[...] * m)      # sublane-broadcast rows
    o_ref[...] = out.astype(o_ref.dtype)


# --------------------------------------------------------------------------- #
# Mask construction (tracks the learnable span_size / span_ratio parameters)  #
# --------------------------------------------------------------------------- #
def _build_soft_mask(T, span_size, span_ratio, max_span, span_ramp):
    """(T, T) float32 mask, already clamped to [0, 1] (clip hoisted out of the
    kernel, kept in f32 so `mask == 0` is exactly `unclamped <= 0`)."""
    idx = jnp.arange(T, dtype=jnp.float32)
    base = -jnp.abs(idx[None, :] - idx[:, None])             # -|i - j|
    span = jnp.asarray(span_size, jnp.float32) * max_span    # span_size * max_span
    left = jnp.floor(span * jnp.asarray(span_ratio, jnp.float32))
    right = span - left - 1.0
    j_le_i = idx[None, :] <= idx[:, None]                    # tril (incl. diagonal)
    m = base + 1.0 + jnp.where(j_le_i, left, right)          # left*tril + right*triu(1)
    m = m / span_ramp + 1.0
    return jnp.clip(m, 0.0, 1.0)


# --------------------------------------------------------------------------- #
# Generation-aware tile planning                                              #
# --------------------------------------------------------------------------- #
@lru_cache(maxsize=1)
def _tpu_vmem_capacity_bytes():
    try:
        return int(pltpu.get_tpu_info().vmem_capacity_bytes)
    except Exception:                                         # pragma: no cover
        return 64 * 1024 * 1024      # conservative: assume v7x-sized VMEM/TC


def _tile_plan(BH, L, itemsize):
    """Returns (TB, tl, grid, vmem_limit_bytes) as static Python ints."""
    vmem_cap = _tpu_vmem_capacity_bytes()
    small_vmem = vmem_cap <= 80 * 1024 * 1024                 # v7x-class (64 MiB/TC)
    # ~8 MiB blocks on v7x halve the exposed per-grid-step overhead at 3.2 TB/s;
    # ~4 MiB is already past the bandwidth knee on v5e/v6e (128 MiB VMEM).
    target = (8 if small_vmem else 4) * 1024 * 1024

    # Packed sublane multiple of the dtype: 8 (4B) / 16 (2B) / 32 (1B).
    sub = {1: 32, 2: 16, 4: 8}.get(itemsize, 8)

    # TB first, then tl from the remaining budget -> TB*tl*itemsize <= target.
    TB = BH if BH <= sub else sub
    tl = max(128, (target // (TB * itemsize)) // 128 * 128)
    if L <= tl:
        tl = L                                                # full lane-dense row
        tb_budget = target // (tl * itemsize)
        TB = BH if tb_budget >= BH else max(TB, (tb_budget // sub) * sub)

    # v7x has 2 TensorCores: guarantee >= 2 grid steps on a "parallel" axis.
    if pl.cdiv(L, tl) * pl.cdiv(BH, TB) < 2:
        if BH >= 2 * sub:
            TB = max(sub, ((BH // 2) // sub) * sub)
        elif L >= 256:                                        # split the lane axis
            tl = max(128, ((L // 2) // 128) * 128)

    grid = (pl.cdiv(L, tl), pl.cdiv(BH, TB))   # BH innermost -> mask block resident

    # vmem_limit from the actual footprint: double-buffered in + out + f32 mask.
    footprint = 4 * TB * tl * itemsize + 2 * tl * 4
    vmem_limit = footprint + 4 * 1024 * 1024                  # compiler-scratch headroom
    vmem_limit = max(vmem_limit, 16 * 1024 * 1024)
    vmem_limit = min(vmem_limit, (40 if small_vmem else 96) * 1024 * 1024)
    return TB, tl, grid, int(vmem_limit)


# --------------------------------------------------------------------------- #
# Public wrapper                                                              #
# --------------------------------------------------------------------------- #
@partial(jax.jit,
         static_argnames=("max_span", "span_ramp", "use_pallas"),
         donate_argnums=(0,))
def adaptive_span_mask2(x, span_size, span_ratio, *, max_span, span_ramp,
                        use_pallas=True):
    """x: (B, H, T, T) attention scores.  Returns same shape/dtype.

    x is donated and written in place by the Pallas path; do not reuse it."""
    B, H, Tq, Tk = x.shape
    assert Tq == Tk, "square attention matrix assumed (mask is (T, T))"
    T = Tk
    mask = _build_soft_mask(T, span_size, span_ratio, max_span, span_ramp)

    if not use_pallas:
        # Tiny shapes / fuse-into-producer path: this op has zero arithmetic
        # intensity, so letting XLA fuse it into the score matmul avoids the
        # standalone HBM round trip entirely.
        return jnp.where(mask == 0.0, 0.0, x * mask).astype(x.dtype)

    BH, L = B * H, T * T
    x2 = x.reshape(BH, L)                                     # lane-dense layout
    itemsize = np.dtype(x.dtype).itemsize
    TB, tl, grid, vmem_limit = _tile_plan(BH, L, itemsize)

    out2 = pl.pallas_call(
        _span_mask_kernel,
        out_shape=jax.ShapeDtypeStruct((BH, L), x.dtype),
        grid=grid,
        in_specs=[
            pl.BlockSpec((1, tl), lambda l, b: (0, l)),       # resident soft mask
            pl.BlockSpec((TB, tl), lambda l, b: (b, l)),      # packed score block
        ],
        out_specs=pl.BlockSpec((TB, tl), lambda l, b: (b, l)),
        input_output_aliases={1: 0},                          # write scores in place
        compiler_params=pltpu.CompilerParams(
            dimension_semantics=("parallel", "parallel"),
            vmem_limit_bytes=vmem_limit,
        ),
    )(mask.reshape(1, L), x2)

    return out2.reshape(B, H, T, T)


# --------------------------------------------------------------------------- #
# Reference + demo                                                            #
# --------------------------------------------------------------------------- #
def _reference(x, span_size, span_ratio, max_span, span_ramp):
    """Pure-numpy replica of AdaptiveSpanMask2.forward for verification."""
    T = x.shape[-1]
    idx = np.arange(T, dtype=np.float32)
    base = -np.abs(idx[None, :] - idx[:, None])               # -|i - j|
    span = span_size * max_span
    left = np.floor(span * span_ratio)
    right = span - left - 1.0
    tril = np.tril(np.ones((T, T), np.float32))
    triu1 = np.triu(np.ones((T, T), np.float32), 1)
    m = base + 1.0 + left * tril + right * triu1
    m = m / span_ramp + 1.0
    out = x * np.clip(m, 0.0, 1.0)
    out = np.where(m <= 0.0, 0.0, out)
    return out.astype(x.dtype)


if __name__ == "__main__":
    # Deterministic parameter init mirroring the module's __init__:
    #   span_size  = nn.Parameter(zeros(1) + init_val)   with init_val = 1.0
    #   span_ratio = buffer zeros(1) + 0.5                (ratio_adaptive=False, causal=False)
    max_span = 16
    span_ramp = 2
    span_size = 1.0
    span_ratio = 0.5

    # x: attention scores (batch=2, heads=4, T=16, T=16)
    key = jax.random.PRNGKey(0)
    x = jax.random.normal(key, (2, 4, 16, 16), dtype=jnp.float32)
    x_np = np.asarray(x)        # snapshot before the (donated, in-place) kernel call

    out = adaptive_span_mask2(x, span_size, span_ratio,
                              max_span=max_span, span_ramp=span_ramp)
    out = jax.block_until_ready(out)

    ref = _reference(x_np, span_size, span_ratio, max_span, span_ramp)
    np.testing.assert_allclose(np.asarray(out), ref, rtol=1e-6, atol=1e-6)

    print("KERNEL_OK")
</pallas_src>

<mosaic_0001>
module attributes {stable_mosaic.version = 11 : i64} {
  func.func @_span_mask_kernel(%arg0: i32, %arg1: i32, %arg2: memref<1x128xf32, #tpu.memory_space<vmem>>, %arg3: memref<8x128xf32, #tpu.memory_space<vmem>>, %arg4: memref<8x128xf32, #tpu.memory_space<vmem>>) attributes {dimension_semantics = [#tpu.dimension_semantics<parallel>, #tpu.dimension_semantics<parallel>], iteration_bounds = array<i64: 2, 1>, scalar_prefetch = 0 : i64, scratch_operands = 0 : i64, tpu.core_type = #tpu.core_type<tc>, window_params = [{transform_indices = @transform_0, window_bounds = array<i64: 1, 128>}, {transform_indices = @transform_1, window_bounds = array<i64: 8, 128>}, {transform_indices = @transform_2, window_bounds = array<i64: 8, 128>}]} {
    %c0 = arith.constant 0 : index
    %c0_0 = arith.constant 0 : index
    %0 = vector.load %arg2[%c0, %c0_0] : memref<1x128xf32, #tpu.memory_space<vmem>>, vector<1x128xf32>
    %cst = arith.constant 0.000000e+00 : f32
    %1 = vector.broadcast %cst : f32 to vector<1x128xf32>
    %2 = arith.cmpf oeq, %0, %1 : vector<1x128xf32>
    %c0_1 = arith.constant 0 : index
    %c0_2 = arith.constant 0 : index
    %3 = vector.load %arg3[%c0_1, %c0_2] : memref<8x128xf32, #tpu.memory_space<vmem>>, vector<8x128xf32>
    %4 = vector.broadcast %0 : vector<1x128xf32> to vector<8x128xf32>
    %5 = arith.mulf %3, %4 : vector<8x128xf32>
    %cst_3 = arith.constant 0.000000e+00 : f32
    %6 = vector.shape_cast %2 : vector<1x128xi1> to vector<1x128xi1>
    %7 = vector.broadcast %6 : vector<1x128xi1> to vector<8x128xi1>
    %8 = vector.broadcast %cst_3 : f32 to vector<8x128xf32>
    %9 = arith.select %7, %8, %5 : vector<8x128xi1>, vector<8x128xf32>
    %c0_4 = arith.constant 0 : index
    %c0_5 = arith.constant 0 : index
    %10 = vector.load %arg4[%c0_4, %c0_5] : memref<8x128xf32, #tpu.memory_space<vmem>>, vector<8x128xf32>
    tpu.vector_store %arg4[%c0_4, %c0_5], %9 {strides = array<i32>} : memref<8x128xf32, #tpu.memory_space<vmem>>, vector<8x128xf32>,
    return
  }
  func.func @transform_0(%arg0: i32, %arg1: i32) -> (i32, i32) {
    %c0_i32 = arith.constant 0 : i32
    %c0_i32_0 = arith.constant 0 : i32
    return %c0_i32, %arg0 : i32, i32
  }
  func.func @transform_1(%arg0: i32, %arg1: i32) -> (i32, i32) {
    %c0_i32 = arith.constant 0 : i32
    return %arg1, %arg0 : i32, i32
  }
  func.func @transform_2(%arg0: i32, %arg1: i32) -> (i32, i32) {
    %c0_i32 = arith.constant 0 : i32
    return %arg1, %arg0 : i32, i32
  }
}

</mosaic_0001>

<bundles_post_ra>
// kernel: adaptive_span_mask2.1
= control target key start
LH: loop header
LB: loop body
LE: loop exit
PB: predicated region body
PF: predicated region fallthrough
CT: control target
= control target key end

     0   :  { %s373_s9 = smov 0   ;;  %s375_s10 = smov 0   ;;  %s406_s0 = inlined_call_operand.vmem [shape: f32[1,256], index: 0, kind: input, shape index: {}]   ;;  %s407_s1 = inlined_call_operand.vmem [shape: f32[8,256], index: 1, kind: input, shape index: {}, may-alias: {1,2}]   ;;  %s408_s2 = inlined_call_operand.vmem [shape: f32[8,256], index: 2, kind: output, shape index: {}, may-alias: {1,2}]  }
   0x1   :  { %s377_s11 = smov 0  }
   0x2 LB: > { %s24_s12 = sadd.s32 1, %s351_s10  ;;  %p303_p0 = scmp.ge.s32.totalorder %s355_s11, 1  ;;  %s355_s11 = sphi %s377_s11, %s12_s11   ;;  %s351_s10 = sphi %s375_s10, %s410_s10   ;;  %s347_s9 = sphi %s373_s9, %s409_s9  }
   0x3   : > { %p26_p1 = scmp.ge.s32.totalorder %s24_s12, 2  ;;  %p139_p2 = scmp.lt.s32.totalorder %s355_s11, 3 }
   0x5   : > { %s412_s12 = smov (%p26_p1, %s24_s12), 0  ;;  %p140_p3 = pnand %p303_p0, %p139_p2 }
   0x6   : > { %p170_p4 = scmp.lt.s32.totalorder (!%p140_p3), %s347_s9, 1  ;;  %v193_v0 = vlaneseq (!%p140_p3)  ;;  %v357_v6 = vmov (!%p140_p3), 0  }
   0x7   : > { %143 = sbr.rel (%p140_p3) target bundleno = 24 (0x18), region = 28 }
   0x8   : > { %v194_v1 = vshrl.u32 (!%p140_p3), %v193_v0, 7 }
   0xa   : > { %v195_v2 = vsub.s32 (!%p140_p3), 0, %v194_v1 }
   0xe   : > { %s414_s9 = smov (!%p170_p4, %s347_s9), 1 }
   0xf   : > { %s172_s15 = scalar_lea.vmem %s406_s0, %s414_s9  ;;  %s304_s16 = sshll.u32 %s414_s9, 3 }
  0x10   : > { %s180_s19 = scalar_lea.vmem %s407_s1, %s304_s16  ;;  %v189_v3 = vld [vmem:[%s172_s15] sm:$0x1]  ;;  %s188_s22 = scalar_lea.vmem %s408_s2, %s304_s16 }
  0x11   : > { %vm190_vm0 = vcmp.eq.f32.partialorder %v189_v3, 0.0  ;;  %v191_v4 = vld [vmem:[%s180_s19] sm:$0xff]  ;;  %v196_v5 = vrot.slane %v189_v3, %v195_v2 }
  0x12   : > { %v199_v7 = vsel %vm190_vm0, 1, %v357_v6 }
  0x13   : > { %v198_v8 = vmul.f32 %v196_v5, %v191_v4  ;;  %v203_v9 = vrot.slane %v199_v7, %v195_v2 }
  0x15   : > { %vm204_vm1 = vcmp.eq.s32.totalorder %v203_v9, 1 }
  0x16   : > { %v205_v10 = vsel %vm204_vm1, 0.0, %v198_v8 }
  0x17   : > { %206 = vst [vmem:[%s188_s22] sm:$0xff] %v205_v10 }
  0x18 PF: > { %s12_s11 = sadd.s32 1, %s355_s11   ;;  %s409_s9 = smov %s351_s10 }
  0x19   : > { %p9_p5 = scmp.ge.s32.totalorder %s12_s11, 4   ;;  %s410_s10 = smov %s412_s12 }
  0x1b   :  { %11 = sbr.rel (!%p9_p5) target bundleno = 2 (0x2), region = 61 }

</bundles_post_ra>
